<compile_context>
chip_gen: v7x
topology: tpu7x:2x2x1
jax: 0.10.0
libtpu: 0.0.40
codegen_flags: <defaults>
</compile_context>

<pallas_src>
import functools

import jax
import jax.numpy as jnp
from jax import lax
from jax.experimental import pallas as pl
from jax.experimental.pallas import tpu as pltpu


def _pool3x3s2(y, sel, *, W):
    """max_pool2d(kernel=3, stride=2, padding=1) on a channel-major block.

    y   : (C, H*W) float32, flat spatial index f = h*W + w (lane-dense).
    sel : (H*W, Ho*Wo) float32 0/1 matrix, sel[2*oh*W + 2*ow, oh*Wo + ow] = 1.
    returns (C, Ho*Wo) float32.
    """
    C, HW = y.shape
    ninf = jnp.float32(-jnp.inf)

    f_idx = lax.broadcasted_iota(jnp.int32, (C, HW), 1)
    if (W & (W - 1)) == 0:                      # W power of two (common case)
        w_idx = jnp.bitwise_and(f_idx, W - 1)
    else:
        w_idx = lax.rem(f_idx, W)

    # Stride-1 3-max along W: lane rolls by +-1; row boundaries masked to -inf
    # (identical to PyTorch's -inf padding semantics).
    left = jnp.where(w_idx == 0, ninf, pltpu.roll(y, 1, axis=1))
    right = jnp.where(w_idx == W - 1, ninf, pltpu.roll(y, HW - 1, axis=1))
    mw = jnp.maximum(jnp.maximum(y, left), right)

    # Stride-1 3-max along H: lane rolls by +-W; first/last image row masked.
    up = jnp.where(f_idx < W, ninf, pltpu.roll(mw, W, axis=1))
    down = jnp.where(f_idx >= HW - W, ninf, pltpu.roll(mw, HW - W, axis=1))
    m1 = jnp.maximum(jnp.maximum(mw, up), down)

    # Stride-2 downsample of BOTH spatial axes in one MXU matmul with a 0/1
    # selection matrix -> dense (C, Ho*Wo) result, no strided lane gathers.
    return jnp.dot(m1, sel, preferred_element_type=jnp.float32)


def _conv1x1_kernel(x_ref, w_ref, b_ref, o_ref):
    """Pointwise conv as a channel matmul; spatial stays on the lane axis.

    x_ref: (1, Cin, T)  w_ref: (Cout, Cin)  b_ref: (Cout, 1)  o_ref: (1, Cout, T)
    """
    y = jnp.dot(w_ref[...], x_ref[0], preferred_element_type=jnp.float32)
    o_ref[0] = (y + b_ref[...]).astype(o_ref.dtype)


def _reduce_pool_kernel(x_ref, w_ref, b_ref, sel_ref, o_ref, *, W):
    """Fused 1x1 conv + 3x3/s2 max pool for one image (NCHW, spatial flattened)."""
    y = jnp.dot(w_ref[...], x_ref[0], preferred_element_type=jnp.float32)
    y = y + b_ref[...]
    o_ref[0] = _pool3x3s2(y, sel_ref[...], W=W).astype(o_ref.dtype)


def _pool_only_kernel(x_ref, sel_ref, o_ref, *, W):
    """3x3/s2 max pool for one image (no channel reduction -> no w/b DMAs)."""
    y = x_ref[0].astype(jnp.float32)
    o_ref[0] = _pool3x3s2(y, sel_ref[...], W=W).astype(o_ref.dtype)


def feature_map_resampler(x_nchw, weight, bias, stride):
    """Pallas implementation of FeatureMapResampler.forward (norm='').

    x_nchw : (N, Cin, H, W)     weight : (Cout, Cin, 1, 1)     bias : (Cout,)
    stride : 1 or 2
    """
    assert stride in (1, 2)
    N, Cin, H, W = x_nchw.shape
    Cout = weight.shape[0]
    do_reduce = Cin != Cout
    do_pool = stride == 2

    if not do_reduce and not do_pool:
        return x_nchw                         # the module forward is the identity

    HW = H * W
    x2d = x_nchw.reshape(N, Cin, HW)          # free row-major reshape, stays NCHW

    if not do_pool:
        # stride == 1: pure 1x1 conv, tiled over the flattened spatial axis.
        w_mat = weight.reshape(Cout, Cin)
        b_mat = bias.reshape(Cout, 1)
        T = HW
        for cand in (2048, 1024, 512, 256, 128):
            if HW % cand == 0:
                T = cand
                break
        out2d = pl.pallas_call(
            _conv1x1_kernel,
            out_shape=jax.ShapeDtypeStruct((N, Cout, HW), x_nchw.dtype),
            grid=(N, HW // T),
            in_specs=[
                pl.BlockSpec((1, Cin, T), lambda n, t: (n, 0, t)),
                pl.BlockSpec((Cout, Cin), lambda n, t: (0, 0)),
                pl.BlockSpec((Cout, 1), lambda n, t: (0, 0)),
            ],
            out_specs=pl.BlockSpec((1, Cout, T), lambda n, t: (n, 0, t)),
            compiler_params=pltpu.CompilerParams(
                dimension_semantics=("parallel", "parallel"),
                vmem_limit_bytes=32 * 1024 * 1024,
            ),
        )(x2d, w_mat, b_mat)
        return out2d.reshape(N, Cout, H, W)

    # stride == 2: fused (optional conv) + max pool, one image per grid step.
    out_c = Cout if do_reduce else Cin
    Ho = (H - 1) // 2 + 1
    Wo = (W - 1) // 2 + 1
    HoWo = Ho * Wo

    # 0/1 downsample-selection matrix: out[c, oh*Wo+ow] = m1[c, 2*oh*W + 2*ow].
    # Computed once in the wrapper (constant), DMA'd once (constant index_map).
    f = jnp.arange(HW, dtype=jnp.int32)[:, None]
    g = jnp.arange(HoWo, dtype=jnp.int32)[None, :]
    src = 2 * (g // Wo) * W + 2 * (g % Wo)
    sel = (f == src).astype(jnp.float32)

    if do_reduce:
        kernel = functools.partial(_reduce_pool_kernel, W=W)
        operands = (x2d, weight.reshape(Cout, Cin), bias.reshape(Cout, 1), sel)
        in_specs = [
            pl.BlockSpec((1, Cin, HW), lambda n: (n, 0, 0)),
            pl.BlockSpec((Cout, Cin), lambda n: (0, 0)),
            pl.BlockSpec((Cout, 1), lambda n: (0, 0)),
            pl.BlockSpec((HW, HoWo), lambda n: (0, 0)),
        ]
    else:
        kernel = functools.partial(_pool_only_kernel, W=W)
        operands = (x2d, sel)
        in_specs = [
            pl.BlockSpec((1, Cin, HW), lambda n: (n, 0, 0)),
            pl.BlockSpec((HW, HoWo), lambda n: (0, 0)),
        ]

    out2d = pl.pallas_call(
        kernel,
        out_shape=jax.ShapeDtypeStruct((N, out_c, HoWo), x_nchw.dtype),
        grid=(N,),
        in_specs=in_specs,
        out_specs=pl.BlockSpec((1, out_c, HoWo), lambda n: (n, 0, 0)),
        compiler_params=pltpu.CompilerParams(
            dimension_semantics=("parallel",),
            vmem_limit_bytes=32 * 1024 * 1024,
        ),
    )(*operands)
    return out2d.reshape(N, out_c, Ho, Wo)


def _reference(x_nchw, weight, bias, stride):
    """Pure-JAX reference mirroring the PyTorch forward (NCHW throughout)."""
    Cin = x_nchw.shape[1]
    Cout = weight.shape[0]
    y = x_nchw
    if Cin != Cout:
        y = jnp.einsum(
            "oc,nchw->nohw", weight.reshape(Cout, Cin), x_nchw,
            precision=jax.lax.Precision.HIGHEST,
        ) + bias[None, :, None, None]
    if stride == 2:
        y = jax.lax.reduce_window(
            y, -jnp.inf, jax.lax.max,
            window_dimensions=(1, 1, 3, 3),
            window_strides=(1, 1, 2, 2),
            padding=((0, 0), (0, 0), (1, 1), (1, 1)),
        )
    return y


if __name__ == "__main__":
    key = jax.random.PRNGKey(0)
    kx, kw, kb, kx2 = jax.random.split(key, 4)

    # Module config from the spec: in_channels=4, out_channels=8, stride=2, norm=''.
    N, Cin, Cout, H, W = 2, 4, 8, 16, 16
    x = jax.random.normal(kx, (N, Cin, H, W), dtype=jnp.float32)
    weight = jax.random.normal(kw, (Cout, Cin, 1, 1), dtype=jnp.float32) * 0.1
    bias = jax.random.normal(kb, (Cout,), dtype=jnp.float32) * 0.1

    # (a) channel reduction + stride-2 max pool (the configured forward path)
    out = jax.block_until_ready(feature_map_resampler(x, weight, bias, 2))
    ref = jax.block_until_ready(_reference(x, weight, bias, 2))
    assert out.shape == (N, Cout, H // 2, W // 2), out.shape
    assert jnp.allclose(out, ref, rtol=1e-5, atol=1e-5), float(jnp.max(jnp.abs(out - ref)))

    # (b) channel reduction only (stride == 1)
    out1 = jax.block_until_ready(feature_map_resampler(x, weight, bias, 1))
    ref1 = jax.block_until_ready(_reference(x, weight, bias, 1))
    assert out1.shape == (N, Cout, H, W), out1.shape
    assert jnp.allclose(out1, ref1, rtol=1e-5, atol=1e-5), float(jnp.max(jnp.abs(out1 - ref1)))

    # (c) stride-2 max pool only (in_channels == out_channels -> no reduction)
    xs = jax.random.normal(kx2, (N, Cout, H, W), dtype=jnp.float32)
    w_id = jnp.zeros((Cout, Cout, 1, 1), jnp.float32)   # unused: Cin == Cout
    b_id = jnp.zeros((Cout,), jnp.float32)
    out2 = jax.block_until_ready(feature_map_resampler(xs, w_id, b_id, 2))
    ref2 = jax.block_until_ready(_reference(xs, w_id, b_id, 2))
    assert out2.shape == (N, Cout, H // 2, W // 2), out2.shape
    assert jnp.allclose(out2, ref2, rtol=1e-5, atol=1e-5), float(jnp.max(jnp.abs(out2 - ref2)))

    print("KERNEL_OK")
</pallas_src>

<mosaic_0001>
module attributes {stable_mosaic.version = 11 : i64} {
  func.func @_reduce_pool_kernel(%arg0: i32, %arg1: memref<1x4x256xf32, #tpu.memory_space<vmem>>, %arg2: memref<8x4xf32, #tpu.memory_space<vmem>>, %arg3: memref<8x1xf32, #tpu.memory_space<vmem>>, %arg4: memref<256x64xf32, #tpu.memory_space<vmem>>, %arg5: memref<1x8x64xf32, #tpu.memory_space<vmem>>) attributes {dimension_semantics = [#tpu.dimension_semantics<parallel>], iteration_bounds = array<i64: 2>, scalar_prefetch = 0 : i64, scratch_operands = 0 : i64, tpu.core_type = #tpu.core_type<tc>, window_params = [{transform_indices = @transform_0, window_bounds = array<i64: 1, 4, 256>}, {pipeline_mode = #tpu.pipeline_mode<synchronous>, transform_indices = @transform_1, window_bounds = array<i64: 8, 4>}, {pipeline_mode = #tpu.pipeline_mode<synchronous>, transform_indices = @transform_2, window_bounds = array<i64: 8, 1>}, {pipeline_mode = #tpu.pipeline_mode<synchronous>, transform_indices = @transform_3, window_bounds = array<i64: 256, 64>}, {transform_indices = @transform_4, window_bounds = array<i64: 1, 8, 64>}]} {
    %c0 = arith.constant 0 : index
    %c0_0 = arith.constant 0 : index
    %0 = vector.load %arg2[%c0, %c0_0] : memref<8x4xf32, #tpu.memory_space<vmem>>, vector<8x4xf32>
    %c0_1 = arith.constant 0 : index
    %c0_2 = arith.constant 0 : index
    %c0_3 = arith.constant 0 : index
    %1 = vector.load %arg1[%c0_1, %c0_2, %c0_3] : memref<1x4x256xf32, #tpu.memory_space<vmem>>, vector<1x4x256xf32>
    %2 = vector.shape_cast %1 : vector<1x4x256xf32> to vector<4x256xf32>
    %cst = arith.constant dense<0.000000e+00> : vector<8x256xf32>
    %3 = tpu.matmul %0, %2, %cst {dimension_numbers = #tpu.dot_dimension_numbers<[1], [0], [0], [1], [0, 0, 1, 1], [], []>} : vector<8x4xf32>, vector<4x256xf32>, vector<8x256xf32> -> vector<8x256xf32>
    %c0_4 = arith.constant 0 : index
    %c0_5 = arith.constant 0 : index
    %4 = vector.load %arg3[%c0_4, %c0_5] : memref<8x1xf32, #tpu.memory_space<vmem>>, vector<8x1xf32>
    %5 = vector.broadcast %4 : vector<8x1xf32> to vector<8x256xf32>
    %6 = arith.addf %3, %5 : vector<8x256xf32>
    %c0_6 = arith.constant 0 : index
    %c0_7 = arith.constant 0 : index
    %7 = vector.load %arg4[%c0_6, %c0_7] : memref<256x64xf32, #tpu.memory_space<vmem>>, vector<256x64xf32>
    %8 = tpu.iota {dimensions = array<i32: 1>} : vector<8x256xi32>
    %c15_i32 = arith.constant 15 : i32
    %9 = vector.broadcast %c15_i32 : i32 to vector<8x256xi32>
    %10 = arith.andi %8, %9 : vector<8x256xi32>
    %c0_i32 = arith.constant 0 : i32
    %11 = vector.broadcast %c0_i32 : i32 to vector<8x256xi32>
    %12 = arith.cmpi eq, %10, %11 : vector<8x256xi32>
    %c1_i32 = arith.constant 1 : i32
    %13 = tpu.dynamic_rotate %6 by %c1_i32 dim 1 : vector<8x256xf32>, i32 -> vector<8x256xf32>
    %cst_8 = arith.constant 0xFF800000 : f32
    %14 = vector.broadcast %cst_8 : f32 to vector<8x256xf32>
    %15 = arith.select %12, %14, %13 : vector<8x256xi1>, vector<8x256xf32>
    %c15_i32_9 = arith.constant 15 : i32
    %16 = vector.broadcast %c15_i32_9 : i32 to vector<8x256xi32>
    %17 = arith.cmpi eq, %10, %16 : vector<8x256xi32>
    %c255_i32 = arith.constant 255 : i32
    %18 = tpu.dynamic_rotate %6 by %c255_i32 dim 1 : vector<8x256xf32>, i32 -> vector<8x256xf32>
    %cst_10 = arith.constant 0xFF800000 : f32
    %19 = vector.broadcast %cst_10 : f32 to vector<8x256xf32>
    %20 = arith.select %17, %19, %18 : vector<8x256xi1>, vector<8x256xf32>
    %21 = arith.maximumf %6, %15 : vector<8x256xf32>
    %22 = arith.maximumf %21, %20 : vector<8x256xf32>
    %c16_i32 = arith.constant 16 : i32
    %23 = vector.broadcast %c16_i32 : i32 to vector<8x256xi32>
    %24 = arith.cmpi slt, %8, %23 : vector<8x256xi32>
    %c16_i32_11 = arith.constant 16 : i32
    %25 = tpu.dynamic_rotate %22 by %c16_i32_11 dim 1 : vector<8x256xf32>, i32 -> vector<8x256xf32>
    %cst_12 = arith.constant 0xFF800000 : f32
    %26 = vector.broadcast %cst_12 : f32 to vector<8x256xf32>
    %27 = arith.select %24, %26, %25 : vector<8x256xi1>, vector<8x256xf32>
    %c240_i32 = arith.constant 240 : i32
    %28 = vector.broadcast %c240_i32 : i32 to vector<8x256xi32>
    %29 = arith.cmpi sge, %8, %28 : vector<8x256xi32>
    %c240_i32_13 = arith.constant 240 : i32
    %30 = tpu.dynamic_rotate %22 by %c240_i32_13 dim 1 : vector<8x256xf32>, i32 -> vector<8x256xf32>
    %cst_14 = arith.constant 0xFF800000 : f32
    %31 = vector.broadcast %cst_14 : f32 to vector<8x256xf32>
    %32 = arith.select %29, %31, %30 : vector<8x256xi1>, vector<8x256xf32>
    %33 = arith.maximumf %22, %27 : vector<8x256xf32>
    %34 = arith.maximumf %33, %32 : vector<8x256xf32>
    %cst_15 = arith.constant dense<0.000000e+00> : vector<8x64xf32>
    %35 = tpu.matmul %34, %7, %cst_15 {dimension_numbers = #tpu.dot_dimension_numbers<[1], [0], [0], [1], [0, 0, 1, 1], [], []>} : vector<8x256xf32>, vector<256x64xf32>, vector<8x64xf32> -> vector<8x64xf32>
    %c0_16 = arith.constant 0 : index
    %c0_17 = arith.constant 0 : index
    %c0_18 = arith.constant 0 : index
    %36 = vector.load %arg5[%c0_16, %c0_17, %c0_18] : memref<1x8x64xf32, #tpu.memory_space<vmem>>, vector<1x8x64xf32>
    %37 = vector.shape_cast %36 : vector<1x8x64xf32> to vector<8x64xf32>
    %38 = vector.shape_cast %35 : vector<8x64xf32> to vector<1x8x64xf32>
    tpu.vector_store %arg5[%c0_16, %c0_17, %c0_18], %38 {strides = array<i32>} : memref<1x8x64xf32, #tpu.memory_space<vmem>>, vector<1x8x64xf32>,
    return
  }
  func.func @transform_0(%arg0: i32) -> (i32, i32, i32) {
    %c0_i32 = arith.constant 0 : i32
    %c0_i32_0 = arith.constant 0 : i32
    %c0_i32_1 = arith.constant 0 : i32
    return %arg0, %c0_i32, %c0_i32_0 : i32, i32, i32
  }
  func.func @transform_1(%arg0: i32) -> (i32, i32) {
    %c0_i32 = arith.constant 0 : i32
    %c0_i32_0 = arith.constant 0 : i32
    %c0_i32_1 = arith.constant 0 : i32
    return %c0_i32, %c0_i32_0 : i32, i32
  }
  func.func @transform_2(%arg0: i32) -> (i32, i32) {
    %c0_i32 = arith.constant 0 : i32
    %c0_i32_0 = arith.constant 0 : i32
    %c0_i32_1 = arith.constant 0 : i32
    return %c0_i32, %c0_i32_0 : i32, i32
  }
  func.func @transform_3(%arg0: i32) -> (i32, i32) {
    %c0_i32 = arith.constant 0 : i32
    %c0_i32_0 = arith.constant 0 : i32
    %c0_i32_1 = arith.constant 0 : i32
    return %c0_i32, %c0_i32_0 : i32, i32
  }
  func.func @transform_4(%arg0: i32) -> (i32, i32, i32) {
    %c0_i32 = arith.constant 0 : i32
    %c0_i32_0 = arith.constant 0 : i32
    %c0_i32_1 = arith.constant 0 : i32
    return %arg0, %c0_i32, %c0_i32_0 : i32, i32, i32
  }
}

</mosaic_0001>

<bundles_post_ra>
// kernel: tpu_custom_call.1
= control target key start
LH: loop header
LB: loop body
LE: loop exit
PB: predicated region body
PF: predicated region fallthrough
CT: control target
= control target key end

     0   :  { %9 = vsyncpa [#allocation3], 0  ;;  %s1002_s0 = inlined_call_operand.vmem [shape: f32[2,4,256], index: 0, kind: input, shape index: {}]   ;;  %s1003_s1 = inlined_call_operand.vmem [shape: f32[8,4], index: 1, kind: input, shape index: {}]   ;;  %s1004_s2 = inlined_call_operand.vmem [shape: f32[8,1], index: 2, kind: input, shape index: {}]   ;;  %s1005_s3 = inlined_call_operand.vmem [shape: f32[256,64], index: 3, kind: input, shape index: {}]   ;;  %s1006_s4 = inlined_call_operand.hbm [shape: f32[2,8,64], index: 4, kind: output, shape index: {}]  }
   0x1   :  { %11 = vsyncpa [#allocation3 + $0x1], 0  ;;  %s764_s15 = smov 0   ;;  %s766_s16 = smov 0  }
   0x2   :  { %s768_s17 = smov 0   ;;  %s770_s18 = smov 0  }
   0x3 LB: > { %s785_s19 = sadd.s32 4294967295, %s730_s18   ;;  %s519_s20 = sadd.s32 4294967294, %s730_s18   ;;  %s730_s18 = sphi %s770_s18, %s1016_s18   ;;  %s726_s17 = sphi %s768_s17, %s1015_s17   ;;  %s722_s16 = sphi %s766_s16, %s1014_s16   ;;  %s718_s15 = sphi %s764_s15, %s1013_s15  }
   0x4   : > { %s789_s21 = sadd.s32 1, %s730_s18   ;;  %s113_s22 = sadd.s32 1, %s726_s17 }
   0x5   : > { %s110_s23 = ssub.s32 %s730_s18, %s789_s21  ;;  %p123_p0 = scmp.ne.s32.totalorder %s726_s17, %s722_s16 }
   0x6   : > { %p111_p1 = scmp.eq.s32.totalorder %s110_s23, 0  ;;  %p124_p2 = scmp.eq.s32.totalorder %s785_s19, 1 }
   0x7   : > { %p129_p3 = scmp.ne.s32.totalorder %s722_s16, %s718_s15  ;;  %p130_p4 = scmp.eq.s32.totalorder %s519_s20, 1 }
   0x8   : > { %s800_s24 = scalar_select %p111_p1, %s726_s17, %s113_s22  }
   0x9   : > { %p802_p5 = por %p124_p2, %p123_p0  ;;  %p806_p6 = por %p130_p4, %p129_p3 }
   0xa   : > { %p522_p7 = scmp.ge.s32.totalorder %s730_s18, 1  ;;  %p165_p8 = scmp.lt.s32.totalorder %s730_s18, 3 }
   0xc   : > { %p166_p9 = pnand %p522_p7, %p165_p8 }
   0xd   : > { %p191_p10 = scmp.lt.s32.totalorder (!%p166_p9), %s785_s19, 1  ;;  %v732_v0 = vmov (!%p166_p9), 0.0   ;;  %v733_v1 = vmov (!%p166_p9), 0   ;;  %v198_v2 = vld [vmem:[%s1004_s2] sm:$0xff] (!%p166_p9)  ;;  %vm210_vm0 = vcmask (!%p166_p9), 1043456   ;;  %vm206_vm1 = vcmask (!%p166_p9), 31744  }
   0xe   : > { %169 = sbr.rel (%p166_p9) target bundleno = 724 (0x2d4), region = 36  ;;  %279 = vmatprep.mubr.f32.mxu0 (!%p166_p9), %v732_v0  ;;  %646 = vset.pattern.permute.xlu0 (!%p166_p9), %v733_v1  ;;  %v196_v5 = vld [vmem:[%s1003_s1] sm:$0xff] (!%p166_p9)  ;;  %v303_v12 = vld [vmem:[%s1005_s3 + $0x88] sm:$0xff] (!%p166_p9)  ;;  %v304_v17 = vld [vmem:[%s1005_s3 + $0x90] sm:$0xff] (!%p166_p9)  ;;  %s734_s9 = smov (!%p166_p9), 127   ;;  %v318_v48 = vlaneseq (!%p166_p9)  ;;  %vm444_vm11 = vcmask (!%p166_p9), 523264  }
   0xf   : > { %201 = vperm.xlu0 (!%p166_p9), %646, %v198_v2   ;;  %v302_v11 = vld [vmem:[%s1005_s3 + $0x80] sm:$0xff] (!%p166_p9)  ;;  %v287_v16 = vld [vmem:[%s1005_s3 + $0x8] sm:$0xff] (!%p166_p9)  ;;  %v305_v18 = vld [vmem:[%s1005_s3 + $0x98] sm:$0xff] (!%p166_p9)  ;;  %s735_s10 = smov (!%p166_p9), 1   ;;  %s736_s8 = smov (!%p166_p9), 112  }
  0x10   : > { %v286_v13 = vld [vmem:[%s1005_s3] sm:$0xff] (!%p166_p9)  ;;  %v569_v15 = vpack.c.bf16 (!%p166_p9), %v303_v12, %v302_v11  ;;  %v573_v20 = vpack.c.bf16 (!%p166_p9), %v305_v18, %v304_v17  ;;  %v288_v21 = vld [vmem:[%s1005_s3 + $0x10] sm:$0xff] (!%p166_p9)  ;;  %v289_v22 = vld [vmem:[%s1005_s3 + $0x18] sm:$0xff] (!%p166_p9)  ;;  %v901_v49 = vand.u32 (!%p166_p9), 127, %v318_v48  ;;  %s530_s12 = sshll.u32 (!%p166_p9), %s785_s19, 7 }
  0x11   : > { %v571_v19 = vpack.c.bf16 (!%p166_p9), %v287_v16, %v286_v13  ;;  %v306_v23 = vld [vmem:[%s1005_s3 + $0xa0] sm:$0xff] (!%p166_p9)  ;;  %v307_v24 = vld [vmem:[%s1005_s3 + $0xa8] sm:$0xff] (!%p166_p9)  ;;  %v575_v25 = vpack.c.bf16 (!%p166_p9), %v289_v22, %v288_v21  ;;  %v308_v29 = vld [vmem:[%s1005_s3 + $0xb0] sm:$0xff] (!%p166_p9)  ;;  %s960_s23 = scalar_lea.hbm (!%p166_p9), %s1006_s4, %s530_s12 }
  0x12   : > { %570 = vmatprep.subr.bf16.mxu1 (!%p166_p9), %v569_v15  ;;  %v577_v26 = vpack.c.bf16 (!%p166_p9), %v307_v24, %v306_v23  ;;  %v290_v27 = vld [vmem:[%s1005_s3 + $0x20] sm:$0xff] (!%p166_p9)  ;;  %v291_v28 = vld [vmem:[%s1005_s3 + $0x28] sm:$0xff] (!%p166_p9)  ;;  %v309_v30 = vld [vmem:[%s1005_s3 + $0xb8] sm:$0xff] (!%p166_p9)  ;;  %v320_v50 = vadd.s32 (!%p166_p9), 128, %v901_v49  ;;  %v321_v53 = vand.u32 (!%p166_p9), 15, %v901_v49  ;;  %vm340_vm2 = vcmp.lt.s32.totalorder (!%p166_p9), %v901_v49, 127 }
  0x13   : > { %572 = vmatpush3.bf16.msra.mxu1 (!%p166_p9), %v571_v19  ;;  %v579_v31 = vpack.c.bf16 (!%p166_p9), %v291_v28, %v290_v27  ;;  %v581_v32 = vpack.c.bf16 (!%p166_p9), %v309_v30, %v308_v29  ;;  %v292_v33 = vld [vmem:[%s1005_s3 + $0x30] sm:$0xff] (!%p166_p9)  ;;  %v293_v34 = vld [vmem:[%s1005_s3 + $0x38] sm:$0xff] (!%p166_p9)  ;;  %v310_v35 = vld [vmem:[%s1005_s3 + $0xc0] sm:$0xff] (!%p166_p9)  ;;  %vm329_vm5 = vcmp.lt.s32.totalorder (!%p166_p9), %v901_v49, 1  ;;  %vm349_vm8 = vcmp.lt.s32.totalorder (!%p166_p9), %v901_v49, 16 }
  0x14   : > { %574 = vmatprep.subr.bf16.mxu1 (!%p166_p9), %v573_v20  ;;  %v311_v36 = vld [vmem:[%s1005_s3 + $0xc8] sm:$0xff] (!%p166_p9)  ;;  %v583_v37 = vpack.c.bf16 (!%p166_p9), %v293_v34, %v292_v33  ;;  %v294_v39 = vld [vmem:[%s1005_s3 + $0x40] sm:$0xff] (!%p166_p9)  ;;  %v312_v41 = vld [vmem:[%s1005_s3 + $0xd0] sm:$0xff] (!%p166_p9)  ;;  %v322_v54 = vand.u32 (!%p166_p9), 15, %v320_v50  ;;  %vm924_vm3 = vcmp.eq.s32.totalorder (!%p166_p9), %v321_v53, 0  ;;  %vm334_vm6 = vcmp.eq.s32.totalorder (!%p166_p9), %v321_v53, 15 }
  0x15   : > { %s192_s29 = scalar_select %p191_p10, %s785_s19, 1  ;;  %v585_v38 = vpack.c.bf16 %v311_v36, %v310_v35  ;;  %v295_v40 = vld [vmem:[%s1005_s3 + $0x48] sm:$0xff]  ;;  %v313_v42 = vld [vmem:[%s1005_s3 + $0xd8] sm:$0xff]  ;;  %v296_v45 = vld [vmem:[%s1005_s3 + $0x50] sm:$0xff]  ;;  %vm360_vm9 = vcmp.ge.s32.totalorder %v320_v50, 240  ;;  %vm365_vm10 = vcmp.lt.s32.totalorder %v901_v49, 112 }
  0x16   : > { %v587_v43 = vpack.c.bf16 %v295_v40, %v294_v39  ;;  %v589_v44 = vpack.c.bf16 %v313_v42, %v312_v41  ;;  %v297_v46 = vld [vmem:[%s1005_s3 + $0x58] sm:$0xff]  ;;  %v314_v51 = vld [vmem:[%s1005_s3 + $0xe0] sm:$0xff]  ;;  %v315_v52 = vld [vmem:[%s1005_s3 + $0xe8] sm:$0xff]  ;;  %vm928_vm4 = vcmp.eq.s32.totalorder %v322_v54, 0  ;;  %vm335_vm7 = vcmp.eq.s32.totalorder %v322_v54, 15  ;;  %s738_s19 = smov [#allocation2]  }
  0x17   : > { %s533_s30 = sshll.u32 %s192_s29, 3  ;;  %576 = vmatpush3.bf16.msra.mxu1 %v575_v25  ;;  %v591_v47 = vpack.c.bf16 %v297_v46, %v296_v45  ;;  %v593_v55 = vpack.c.bf16 %v315_v52, %v314_v51  ;;  %v298_v56 = vld [vmem:[%s1005_s3 + $0x60] sm:$0xff]  ;;  %v299_v57 = vld [vmem:[%s1005_s3 + $0x68] sm:$0xff]  ;;  %v316_v59 = vld [vmem:[%s1005_s3 + $0xf0] sm:$0xff]  ;;  %s672_s29 = sshll.u32 %s738_s19, 4  ;;  %s673_s29 = int_to_ptr.vmem [resolvable:$false] %s672_s29 }
  0x18   : > { %s195_s7 = scalar_lea.vmem %s1002_s0, %s533_s30  ;;  %578 = vmatprep.subr.bf16.mxu1 %v577_v26  ;;  %v595_v58 = vpack.c.bf16 %v299_v57, %v298_v56  ;;  %v317_v60 = vld [vmem:[%s1005_s3 + $0xf8] sm:$0xff]  ;;  %v300_v2 = vld [vmem:[%s1005_s3 + $0x70] sm:$0xff]  ;;  %s674_s30 = scalar_lea.vmem %s673_s29, 256 }
  0x19   : > { %v197_v3 = vld [vmem:[%s195_s7] sm:$0xff]  ;;  %v597_v1 = vpack.c.bf16 %v317_v60, %v316_v59 }
  0x1a   : > { %v205_v4 = vcombine.high %v197_v3, %v197_v3 }
  0x1b   : > { %580 = vmatpush3.bf16.msra.mxu1 %v579_v31 }
  0x1c   : > { %526 = vmatprep.subr.msk.mxu0 %vm210_vm0, %v205_v4  ;;  %582 = vmatprep.subr.bf16.mxu1 %v581_v32 }
  0x1d   : > { %527 = vmatpush1.msk.msra.mxu0 %vm210_vm0, %v197_v3  ;;  %v301_v3 = vld [vmem:[%s1005_s3 + $0x78] sm:$0xff] }
  0x1e   : > { %528 = vmatmul.mubr.msk.f32.vlgmr.msra.gmra.mrb[0].mxu0 %vm206_vm1, %v196_v5 }
  0x1f   : > { %584 = vmatpush3.bf16.msra.mxu1 %v583_v37 }
  0x20   : > { %586 = vmatprep.subr.bf16.mxu1 %v585_v38 }
  0x23   : > { %588 = vmatpush3.bf16.msra.mxu1 %v587_v43 }
  0x24   : > { %590 = vmatprep.subr.bf16.mxu1 %v589_v44 }
  0x27   : > { %592 = vmatpush3.bf16.msra.mxu1 %v591_v47 }
  0x28   : > { %594 = vmatprep.subr.bf16.mxu1 %v593_v55 }
  0x2b   : > { %596 = vmatpush3.bf16.msra.mxu1 %v595_v58 }
  0x2c   : > { %598 = vmatprep.subr.bf16.mxu1 %v597_v1 }
  0x8e   : > { %v202_v6 = vpop.permute.xlu0 %201 }
  0xf1   : > { %v281_v7 = vpop.f32.mrb[0].mxu0 }
  0xf2   : > { %v823_v8 = vadd.f32 %v281_v7, %v202_v6  ;;  %v283_v9 = vpop.f32.mrb[1].mxu0 }
  0xf3   : > { %v825_v10 = vadd.f32 %v283_v9, %v202_v6  ;;  %v599_v9 = vpack.c.bf16 %v301_v3, %v300_v2 }
  0xf5   : > { %v652_v14 = vpack.i.bf16 %v825_v10, %v823_v8  ;;  %600 = vmatpush3.bf16.msra.mxu1 %v599_v9 }
  0xf7   : > { %653 = vrot.lane.b32.xlu1 %v652_v14, %s734_s9  ;;  %648 = vrot.lane.b32.xlu0 %v652_v14, %s735_s10  ;;  %s737_s9 = smov 16   ;;  %s188_s10 = sand.u32 1, %s722_s16  }
  0xf8   : > { %s523_s11 = sshll.u32 %s188_s10, 3  ;;  %s447_s27 = scalar_lea.sflag [#allocation3], %s188_s10 }
  0xf9   : > { %s190_s13 = scalar_lea.vmem [#allocation2], %s523_s11 }
  0xfa   : > { %s460_s14 = sshll.u32 %s190_s13, 4  ;;  %s962_s14 = int_to_ptr.vmem [resolvable:$true] %s460_s14 }
  0xfb   : > { %s668_s28 = scalar_lea.vmem %s962_s14, 128  ;;  %p675_p0 = scmp.lt.s32.totalorder %s962_s14, %s673_s29 }
  0xfc   : > { %p669_p11 = scmp.ne.s32.totalorder %s962_s14, %s668_s28  ;;  %p676_p1 = scmp.lt.s32.totalorder %s674_s30, %s668_s28 }
  0xfe   : > { %p670_p12 = pnand %p669_p11, %p802_p5  ;;  %p677_p2 = por %p676_p1, %p675_p0 }
 0x100   : > { %p671_p13 = pneg %p670_p12 }
 0x102   : > { %p678_p3 = pnand %p677_p2, %p671_p13 }
 0x169   : > { %v654_v61 = vpop.permute.xlu1 %653  ;;  %v649_v0 = vpop.permute.xlu0 %648 }
 0x16a   : > { %v656_v4 = vunpack.i.h.bf16 %v654_v61  ;;  %v655_v5 = vunpack.i.l.bf16 %v654_v61  ;;  %v651_v6 = vunpack.i.h.bf16 %v649_v0  ;;  %v650_v7 = vunpack.i.l.bf16 %v649_v0 }
 0x16c   : > { %v341_v11 = vsel %vm340_vm2, %v655_v5, %v656_v4  ;;  %v342_v12 = vsel %vm340_vm2, %v656_v4, %v655_v5  ;;  %v330_v13 = vsel %vm329_vm5, %v650_v7, %v651_v6  ;;  %v331_v14 = vsel %vm329_vm5, %v651_v6, %v650_v7 }
 0x16d   : > { %v332_v15 = vsel %vm924_vm3, -inf, %v331_v14  ;;  %v333_v16 = vsel %vm928_vm4, -inf, %v330_v13  ;;  %v343_v19 = vsel %vm334_vm6, -inf, %v341_v11  ;;  %v344_v20 = vsel %vm335_vm7, -inf, %v342_v12 }
 0x16e   : > { %v345_v17 = vmax.f32 %v823_v8, %v332_v15  ;;  %v346_v18 = vmax.f32 %v825_v10, %v333_v16 }
 0x170   : > { %v347_v21 = vmax.f32 %v345_v17, %v343_v19  ;;  %v348_v22 = vmax.f32 %v346_v18, %v344_v20 }
 0x172   : > { %v662_v23 = vpack.i.bf16 %v348_v22, %v347_v21 }
 0x174   : > { %663 = vrot.lane.b32.xlu0 %v662_v23, %s736_s8  ;;  %658 = vrot.lane.b32.xlu1 %v662_v23, %s737_s9 }
 0x1e6   : > { %v664_v24 = vpop.permute.xlu0 %663  ;;  %v659_v25 = vpop.permute.xlu1 %658 }
 0x1e7   : > { %v666_v26 = vunpack.i.h.bf16 %v664_v24  ;;  %v665_v8 = vunpack.i.l.bf16 %v664_v24  ;;  %v661_v10 = vunpack.i.h.bf16 %v659_v25  ;;  %v660_v27 = vunpack.i.l.bf16 %v659_v25 }
 0x1e9   : > { %v356_v28 = vsel %vm349_vm8, %v661_v10, %v660_v27  ;;  %v355_v29 = vsel %vm349_vm8, %v660_v27, %v661_v10  ;;  %v367_v30 = vsel %vm365_vm10, %v666_v26, %v665_v8  ;;  %v366_v36 = vsel %vm365_vm10, %v665_v8, %v666_v26 }
 0x1ea   : > { %v357_v31 = vsel %vm349_vm8, -inf, %v356_v28  ;;  %v369_v32 = vsel %vm360_vm9, -inf, %v367_v30  ;;  %v371_v33 = vmax.f32 %v348_v22, %v355_v29 }
 0x1eb   : > { %v370_v34 = vmax.f32 %v347_v21, %v357_v31 }
 0x1ec   : > { %v373_v35 = vmax.f32 %v371_v33, %v369_v32 }
 0x1ed   : > { %v372_v37 = vmax.f32 %v370_v34, %v366_v36 }
 0x1ee   : > { %438 = vmatprep.mubr.f32.mxu1 %v373_v35 }
 0x1ef   : > { %439 = vmatmul.mubr.f32.vlgmr.msra.gmra.mrb[0].mxu1 %v372_v37 }
 0x2c2   : > { %v566_v38 = vpop.f32.mrb[0].mxu1 }
 0x2c3   : > { %v567_v39 = vpop.f32.mrb[1].mxu1 }
 0x2c4   : > { %v568_v40 = vadd.f32 %v567_v39, %v566_v38 }
 0x2c6   : > { %445 = vst.msk [vmem:[%s190_s13] sm:$0xff] %vm444_vm11, %v568_v40 }
 0x2c7   : > { %681 = shalt.err (!%p678_p3)
}
 0x2c8   : > { %s682_s5 = scalar_lea.hbm %s960_s23, 128  ;;  %s686_s8 = scalar_lea.hbm %s1006_s4, 256 }
 0x2c9   : > { %p683_p4 = scmp.ne.s32.totalorder %s960_s23, %s682_s5  ;;  %p687_p9 = scmp.lt.u32.totalorder %s960_s23, %s1006_s4 }
 0x2ca   : > { %p688_p10 = scmp.lt.u32.totalorder %s686_s8, %s682_s5  ;;  %p690_p12 = scmp.lt.u32.totalorder %s682_s5, %s960_s23 }
 0x2cb   : > { %p684_p7 = pnand %p683_p4, %p802_p5 }
 0x2cc   : > { %p689_p11 = por %p688_p10, %p687_p9 }
 0x2cd   : > { %p685_p8 = pneg %p684_p7 }
 0x2ce   : > { %p691_p13 = por %p690_p12, %p689_p11 }
 0x2d0   : > { %p692_p0 = pnand %p691_p13, %p685_p8 }
 0x2d2   : > { %695 = shalt.err (!%p692_p0)
}
 0x2d3   : > { %601 = dma.vmem_to_hbm [thread:$0]  (%p802_p5), %s962_s14, 128, %s960_s23, %s447_s27  }
 0x2d4 PF: > { %p607_p1 = scmp.ge.s32.totalorder %s730_s18, 2  ;;  %s472_s11 = sand.u32 1, %s718_s15  }
 0x2d5   : > { %s473_s12 = scalar_lea.sflag [#allocation3], %s472_s11 }
 0x2d6   : > { %p604_p2 = pnand %p607_p1, %p806_p6 }
 0x2d8   : > { %713 = dma.done.wait (!%p604_p2), %s473_s12, 128  }
 0x2d9   : > { %715 = vsyncadd (!%p604_p2), %s473_s12, 4294967168  ;;  %p14_p3 = scmp.ge.s32.totalorder %s789_s21, 4   ;;  %s1013_s15 = smov %s722_s16 }
 0x2da   : > { %s1014_s16 = smov %s726_s17  ;;  %s1015_s17 = smov %s800_s24 }
 0x2db   : > { %s1016_s18 = smov %s789_s21  ;;  %16 = sbr.rel (!%p14_p3) target bundleno = 3 (0x3), region = 71 }
 0x2e2   :  { %478 = vsyncpa [#allocation3], 1 }
 0x2e3   :  { %480 = vsyncpa [#allocation3 + $0x1], 1 }

</bundles_post_ra>
